<compile_context>
chip_gen: v7x
topology: tpu7x:2x2x1
jax: 0.10.0
libtpu: 0.0.40
codegen_flags: <defaults>
</compile_context>

<pallas_src>
import functools

import jax
import jax.numpy as jnp
from jax.experimental import pallas as pl
from jax.experimental.pallas import tpu as pltpu


# ---------------------------------------------------------------------------
# Parameter constraint (GreaterThanConstraint(min_value=0.0) == softplus link)
# ---------------------------------------------------------------------------
def constraint_transform(free):
    return jax.nn.softplus(free)


def constraint_inv_transform(value):
    return jnp.log(jnp.expm1(value))


def _round_up(x, m):
    return ((x + m - 1) // m) * m


_VMEM_BUDGET = 36 << 20   # target working-set (leaves headroom on v7x's 64 MiB)
_VMEM_LIMIT = 48 << 20    # scoped-VMEM limit handed to Mosaic (> 16/32 MiB defaults)


# ---------------------------------------------------------------------------
# Kernel bodies.  After wrapper-side folding:
#     ab  = x1 @ (x2^T / ls^2)                  (MXU, f32 accumulate)
#     a2' = -0.5*||x1||^2/ls^2                  (tm, 1)
#     b2' = -0.5*||x2||^2/ls^2 + log(os)        (1, tn)
#     out = exp(min(ab + a2' + b2', log(os)))   (clamp guards fp cancellation)
# ---------------------------------------------------------------------------
def _epilogue(ab, a2, b2, log_os, out_ref):
    arg = jnp.minimum(ab + a2 + b2, log_os)
    out_ref[...] = jnp.exp(arg).astype(out_ref.dtype)


def _streamed_body(scal_ref, x1_ref, x2t_ref, a2_ref, b2_ref, out_ref):
    ab = jnp.dot(x1_ref[...], x2t_ref[...], preferred_element_type=jnp.float32)
    _epilogue(ab, a2_ref[...], b2_ref[...], scal_ref[0, 0], out_ref)


def _resident_body(tn, scal_ref, x1_ref, x2t_ref, a2_ref, b2_ref, out_ref):
    # x2^T / b2' stay resident in VMEM for the whole call; slice this tile's cols.
    j = pl.program_id(1)
    c0 = pl.multiple_of(j * tn, 128)
    x2t_blk = x2t_ref[:, pl.ds(c0, tn)]
    b2_blk = b2_ref[:, pl.ds(c0, tn)]
    ab = jnp.dot(x1_ref[...], x2t_blk, preferred_element_type=jnp.float32)
    _epilogue(ab, a2_ref[...], b2_blk, scal_ref[0, 0], out_ref)


def _tri_body(bi_ref, bj_ref, scal_ref, x1_ref, x2t_ref, a2_ref, b2_ref, out_ref):
    del bi_ref, bj_ref   # used only by the index_maps
    ab = jnp.dot(x1_ref[...], x2t_ref[...], preferred_element_type=jnp.float32)
    _epilogue(ab, a2_ref[...], b2_ref[...], scal_ref[0, 0], out_ref)


# ---------------------------------------------------------------------------
# Wrapper-side (one-time, O(M*D)/O(N*D)) precompute of the folded operands.
# ---------------------------------------------------------------------------
def _prepare_operands(x1p, x2p, coeff, log_os, mm_dtype):
    x1_mm = x1p.astype(mm_dtype)
    x2t_mm = (x2p.astype(jnp.float32).T * (-2.0 * coeff)).astype(mm_dtype)
    a2p = coeff * jnp.sum(jnp.square(x1p.astype(jnp.float32)), axis=-1, keepdims=True)
    b2p = (coeff * jnp.sum(jnp.square(x2p.astype(jnp.float32)), axis=-1))[None, :] + log_os
    scal = jnp.reshape(log_os, (1, 1)).astype(jnp.float32)
    return x1_mm, x2t_mm, a2p.astype(jnp.float32), b2p.astype(jnp.float32), scal


def _pick_tiles(M, N, D, es_in, es_out, *, tm_max, tn_max):
    if D <= 256:
        # tiny per-step input footprint -> larger lane-dense output tiles
        tn_max = max(tn_max, 1024)
    tm = min(tm_max, _round_up(M, 8))
    tn = min(tn_max, _round_up(N, 128))

    def est(tm_, tn_):
        return (2 * tm_ * D * es_in        # x1 tile, double buffered
                + 2 * D * tn_ * es_in      # x2^T tile, double buffered (worst case)
                + 2 * tm_ * tn_ * es_out   # output tile, double buffered
                + 3 * tm_ * tn_ * 4        # f32 ab / arg intermediates
                + 4 * (tm_ + tn_) * 4)     # norm vectors

    while est(tm, tn) > _VMEM_BUDGET and (tn > 128 or tm > 8):
        if tn > 128:
            tn = max(128, tn // 2)
        else:
            tm = max(8, _round_up(tm // 2, 8))
    # TODO(synk): for very large D add a K-axis grid with an f32 VMEM accumulator
    # (pl.when init / epilogue) instead of shrinking tiles further.
    return tm, tn


def _symmetric_gram(x1, coeff, log_os, mm_dtype, out_dtype, t, nb, M, D):
    """Upper-triangular block-pair Gram matrix K(x1, x1), mirrored outside."""
    M_pad = nb * t
    x1p = x1 if M_pad == M else jnp.pad(x1, ((0, M_pad - M), (0, 0)))
    x1_mm, x2t_mm, a2p, b2p, scal = _prepare_operands(x1p, x1p, coeff, log_os, mm_dtype)

    bi_list, bj_list = [], []
    for i in range(nb):
        for j in range(i, nb):
            bi_list.append(i)
            bj_list.append(j)
    bi_arr = jnp.asarray(bi_list, jnp.int32)
    bj_arr = jnp.asarray(bj_list, jnp.int32)
    n_pairs = len(bi_list)

    smem_spec = pl.BlockSpec((1, 1), lambda *_: (0, 0),
                             memory_space=pltpu.MemorySpace.SMEM)

    out = pl.pallas_call(
        _tri_body,
        out_shape=jax.ShapeDtypeStruct((M_pad, M_pad), out_dtype),
        grid_spec=pltpu.PrefetchScalarGridSpec(
            num_scalar_prefetch=2,
            grid=(n_pairs,),
            in_specs=[
                smem_spec,
                pl.BlockSpec((t, D), lambda p, bi_r, bj_r: (bi_r[p], 0)),
                pl.BlockSpec((D, t), lambda p, bi_r, bj_r: (0, bj_r[p])),
                pl.BlockSpec((t, 1), lambda p, bi_r, bj_r: (bi_r[p], 0)),
                pl.BlockSpec((1, t), lambda p, bi_r, bj_r: (0, bj_r[p])),
            ],
            out_specs=pl.BlockSpec((t, t), lambda p, bi_r, bj_r: (bi_r[p], bj_r[p])),
        ),
        compiler_params=pltpu.CompilerParams(
            dimension_semantics=("arbitrary",),
            vmem_limit_bytes=_VMEM_LIMIT),
    )(bi_arr, bj_arr, scal, x1_mm, x2t_mm, a2p, b2p)

    # Mirror the computed upper-triangular blocks into the unwritten lower ones.
    rblk = jnp.arange(M_pad, dtype=jnp.int32) // t
    upper = rblk[:, None] <= rblk[None, :]
    full = jnp.where(upper, out, out.T)
    return full[:M, :M]


def gaussian_kernel_forward(free_length_scale, free_output_scale,
                            x1, x2=None, diag=False, *,
                            tm_max=256, tn_max=512, tsym_max=256,
                            resident_bytes_limit=8 << 20,
                            use_bf16_matmul=False,
                            out_dtype=None):
    length_scale = constraint_transform(free_length_scale).astype(jnp.float32)
    output_scale = constraint_transform(free_output_scale).astype(jnp.float32)
    out_dtype = x1.dtype if out_dtype is None else out_dtype

    if diag:
        # trivial path: output_scale * ones((M, 1)); no hot loop to offload
        return (output_scale * jnp.ones((x1.shape[0], 1), jnp.float32)).astype(out_dtype)

    coeff = -0.5 / (length_scale * length_scale)   # negative
    log_os = jnp.log(output_scale)                 # softplus => output_scale > 0

    symmetric = x2 is None
    if symmetric:
        x2 = x1

    M, D = x1.shape
    N, _ = x2.shape

    mm_dtype = (jnp.bfloat16
                if (use_bf16_matmul and x1.dtype == jnp.float32) else x1.dtype)
    es_in = jnp.dtype(mm_dtype).itemsize
    es_out = jnp.dtype(out_dtype).itemsize

    # ----- symmetric Gram matrix: upper-triangular block pairs only ---------
    if symmetric:
        t = max(128, min(tsym_max, _round_up(M, 128)))
        while t > 128 and (4 * t * D * es_in + 2 * t * t * es_out
                           + 3 * t * t * 4) > _VMEM_BUDGET:
            t -= 128
        nb = _round_up(M, t) // t
        if nb >= 2:
            return _symmetric_gram(x1, coeff, log_os, mm_dtype, out_dtype, t, nb, M, D)

    # ----- general rectangular path ------------------------------------------
    tm, tn = _pick_tiles(M, N, D, es_in, es_out, tm_max=tm_max, tn_max=tn_max)
    M_pad = _round_up(M, tm)
    N_pad = _round_up(N, tn)

    # v7x has 2 TensorCores: make sure the parallel grid has >= 2 blocks.
    if (M_pad // tm) * (N_pad // tn) == 1 and tm > 8:
        tm = max(8, _round_up(tm // 2, 8))
        M_pad = _round_up(M, tm)

    x1p = x1 if M_pad == M else jnp.pad(x1, ((0, M_pad - M), (0, 0)))
    x2p = x2 if N_pad == N else jnp.pad(x2, ((0, N_pad - N), (0, 0)))
    x1_mm, x2t_mm, a2p, b2p, scal = _prepare_operands(x1p, x2p, coeff, log_os, mm_dtype)

    grid_m = M_pad // tm
    grid_n = N_pad // tn

    resident_bytes = D * N_pad * es_in + N_pad * 4
    make_resident = (
        resident_bytes <= resident_bytes_limit
        and (2 * resident_bytes + 2 * tm * D * es_in
             + 2 * tm * tn * es_out + 3 * tm * tn * 4) <= _VMEM_BUDGET)

    smem_spec = pl.BlockSpec((1, 1), lambda *_: (0, 0),
                             memory_space=pltpu.MemorySpace.SMEM)
    cparams = pltpu.CompilerParams(
        dimension_semantics=("parallel", "parallel"),
        vmem_limit_bytes=_VMEM_LIMIT)

    if make_resident:
        # x2^T / b2' DMA'd once and held resident; x1 keyed to the outer axis
        # => every input read from HBM ~once, only the output write streams.
        grid = (grid_m, grid_n)
        kernel = functools.partial(_resident_body, tn)
        in_specs = [
            smem_spec,
            pl.BlockSpec((tm, D), lambda i, j: (i, 0)),
            pl.BlockSpec((D, N_pad), lambda i, j: (0, 0)),
            pl.BlockSpec((tm, 1), lambda i, j: (i, 0)),
            pl.BlockSpec((1, N_pad), lambda i, j: (0, 0)),
        ]
        out_spec = pl.BlockSpec((tm, tn), lambda i, j: (i, j))
    else:
        # Streamed fallback: N outer / M inner so the wider (D, tn) x2^T tile is
        # the reused operand and x1 is the streamed one (halves repeated DMA).
        grid = (grid_n, grid_m)
        kernel = _streamed_body
        in_specs = [
            smem_spec,
            pl.BlockSpec((tm, D), lambda j, i: (i, 0)),
            pl.BlockSpec((D, tn), lambda j, i: (0, j)),
            pl.BlockSpec((tm, 1), lambda j, i: (i, 0)),
            pl.BlockSpec((1, tn), lambda j, i: (0, j)),
        ]
        out_spec = pl.BlockSpec((tm, tn), lambda j, i: (i, j))

    out = pl.pallas_call(
        kernel,
        out_shape=jax.ShapeDtypeStruct((M_pad, N_pad), out_dtype),
        grid_spec=pltpu.PrefetchScalarGridSpec(
            num_scalar_prefetch=0,
            grid=grid,
            in_specs=in_specs,
            out_specs=out_spec,
        ),
        compiler_params=cparams,
    )(scal, x1_mm, x2t_mm, a2p, b2p)

    if M_pad != M or N_pad != N:
        out = out[:M, :N]
    return out


def reference_forward(free_length_scale, free_output_scale, x1, x2=None):
    length_scale = constraint_transform(free_length_scale)
    output_scale = constraint_transform(free_output_scale)
    if x2 is None:
        x2 = x1
    a = x1 / length_scale
    b = x2 / length_scale
    d2 = jnp.sum((a[:, None, :] - b[None, :, :]) ** 2, axis=-1)
    return output_scale * jnp.exp(-0.5 * d2)


if __name__ == "__main__":
    key = jax.random.PRNGKey(0)
    k1, k2, k3 = jax.random.split(key, 3)

    # deterministic "module init": length_scale=1.5, output_scale=2.0
    free_length_scale = constraint_inv_transform(jnp.asarray(1.5, jnp.float32))
    free_output_scale = constraint_inv_transform(jnp.asarray(2.0, jnp.float32))

    M, N, D = 16, 8, 32
    x1 = jax.random.normal(k1, (M, D), dtype=jnp.float32)
    x2 = jax.random.normal(k2, (N, D), dtype=jnp.float32)

    # cross kernel K(x1, x2): resident-x2t path
    out = jax.block_until_ready(
        gaussian_kernel_forward(free_length_scale, free_output_scale, x1, x2))
    ref = reference_forward(free_length_scale, free_output_scale, x1, x2)
    assert out.shape == (M, N) and out.dtype == x1.dtype
    assert jnp.allclose(out, ref, atol=1e-5, rtol=1e-4), \
        float(jnp.max(jnp.abs(out - ref)))

    # streamed fallback path (forced)
    out_s = jax.block_until_ready(
        gaussian_kernel_forward(free_length_scale, free_output_scale, x1, x2,
                                resident_bytes_limit=0))
    assert jnp.allclose(out_s, ref, atol=1e-5, rtol=1e-4)

    # small symmetric Gram (single block => general path)
    out_sym = jax.block_until_ready(
        gaussian_kernel_forward(free_length_scale, free_output_scale, x1))
    ref_sym = reference_forward(free_length_scale, free_output_scale, x1)
    assert out_sym.shape == (M, M)
    assert jnp.allclose(out_sym, ref_sym, atol=1e-5, rtol=1e-4)

    # larger symmetric Gram: exercises the upper-triangular block-pair path
    Ms = 200
    x1s = jax.random.normal(k3, (Ms, D), dtype=jnp.float32)
    out_tri = jax.block_until_ready(
        gaussian_kernel_forward(free_length_scale, free_output_scale, x1s,
                                tsym_max=128))
    ref_tri = reference_forward(free_length_scale, free_output_scale, x1s)
    assert out_tri.shape == (Ms, Ms)
    assert jnp.allclose(out_tri, ref_tri, atol=1e-5, rtol=1e-4), \
        float(jnp.max(jnp.abs(out_tri - ref_tri)))

    # optional bf16-MXU path (looser tolerance, f32 norms/accumulation)
    out_bf = jax.block_until_ready(
        gaussian_kernel_forward(free_length_scale, free_output_scale, x1, x2,
                                use_bf16_matmul=True))
    assert out_bf.shape == (M, N)
    assert jnp.allclose(out_bf, ref, atol=5e-2, rtol=1e-1)

    # diag path
    diag_out = gaussian_kernel_forward(free_length_scale, free_output_scale,
                                       x1, diag=True)
    assert diag_out.shape == (M, 1) and diag_out.dtype == x1.dtype

    print("KERNEL_OK")
</pallas_src>

<mosaic_0001>
module attributes {stable_mosaic.version = 11 : i64} {
  func.func @_resident_body(%arg0: i32, %arg1: i32, %arg2: memref<1x1xf32, #tpu.memory_space<smem>>, %arg3: memref<8x32xf32, #tpu.memory_space<vmem>>, %arg4: memref<32x128xf32, #tpu.memory_space<vmem>>, %arg5: memref<8x1xf32, #tpu.memory_space<vmem>>, %arg6: memref<1x128xf32, #tpu.memory_space<vmem>>, %arg7: memref<8x128xf32, #tpu.memory_space<vmem>>) attributes {dimension_semantics = [#tpu.dimension_semantics<parallel>, #tpu.dimension_semantics<parallel>], iteration_bounds = array<i64: 2, 1>, scalar_prefetch = 0 : i64, scratch_operands = 0 : i64, tpu.core_type = #tpu.core_type<tc>, window_params = [{transform_indices = @transform_0, window_bounds = array<i64: 1, 1>}, {transform_indices = @transform_1, window_bounds = array<i64: 8, 32>}, {pipeline_mode = #tpu.pipeline_mode<synchronous>, transform_indices = @transform_2, window_bounds = array<i64: 32, 128>}, {transform_indices = @transform_3, window_bounds = array<i64: 8, 1>}, {pipeline_mode = #tpu.pipeline_mode<synchronous>, transform_indices = @transform_4, window_bounds = array<i64: 1, 128>}, {transform_indices = @transform_5, window_bounds = array<i64: 8, 128>}]} {
    %c128_i32 = arith.constant 128 : i32
    %0 = arith.muli %arg1, %c128_i32 : i32
    %1 = tpu.assume_multiple %0, 128 : i32
    %c0 = arith.constant 0 : index
    %2 = arith.index_cast %1 : i32 to index
    %3 = vector.load %arg4[%c0, %2] : memref<32x128xf32, #tpu.memory_space<vmem>>, vector<32x128xf32>
    %c0_0 = arith.constant 0 : index
    %4 = arith.index_cast %1 : i32 to index
    %5 = vector.load %arg6[%c0_0, %4] : memref<1x128xf32, #tpu.memory_space<vmem>>, vector<1x128xf32>
    %c0_1 = arith.constant 0 : index
    %c0_2 = arith.constant 0 : index
    %6 = vector.load %arg3[%c0_1, %c0_2] : memref<8x32xf32, #tpu.memory_space<vmem>>, vector<8x32xf32>
    %cst = arith.constant dense<0.000000e+00> : vector<8x128xf32>
    %7 = tpu.matmul %6, %3, %cst {dimension_numbers = #tpu.dot_dimension_numbers<[1], [0], [0], [1], [0, 0, 1, 1], [], []>} : vector<8x32xf32>, vector<32x128xf32>, vector<8x128xf32> -> vector<8x128xf32>
    %c0_3 = arith.constant 0 : index
    %c0_4 = arith.constant 0 : index
    %8 = vector.load %arg5[%c0_3, %c0_4] : memref<8x1xf32, #tpu.memory_space<vmem>>, vector<8x1xf32>
    %c0_5 = arith.constant 0 : index
    %c0_6 = arith.constant 0 : index
    %9 = memref.load %arg2[%c0_5, %c0_6] : memref<1x1xf32, #tpu.memory_space<smem>>
    %10 = vector.broadcast %8 : vector<8x1xf32> to vector<8x128xf32>
    %11 = arith.addf %7, %10 : vector<8x128xf32>
    %12 = vector.broadcast %5 : vector<1x128xf32> to vector<8x128xf32>
    %13 = arith.addf %11, %12 : vector<8x128xf32>
    %14 = vector.broadcast %9 : f32 to vector<8x128xf32>
    %15 = arith.minimumf %13, %14 : vector<8x128xf32>
    %16 = math.exp %15 : vector<8x128xf32>
    %c0_7 = arith.constant 0 : index
    %c0_8 = arith.constant 0 : index
    %17 = vector.load %arg7[%c0_7, %c0_8] : memref<8x128xf32, #tpu.memory_space<vmem>>, vector<8x128xf32>
    tpu.vector_store %arg7[%c0_7, %c0_8], %16 {strides = array<i32>} : memref<8x128xf32, #tpu.memory_space<vmem>>, vector<8x128xf32>,
    return
  }
  func.func @transform_0(%arg0: i32, %arg1: i32) -> (i32, i32) {
    %c0_i32 = arith.constant 0 : i32
    %c0_i32_0 = arith.constant 0 : i32
    %c0_i32_1 = arith.constant 0 : i32
    return %c0_i32, %c0_i32_0 : i32, i32
  }
  func.func @transform_1(%arg0: i32, %arg1: i32) -> (i32, i32) {
    %c0_i32 = arith.constant 0 : i32
    %c0_i32_0 = arith.constant 0 : i32
    return %arg0, %c0_i32 : i32, i32
  }
  func.func @transform_2(%arg0: i32, %arg1: i32) -> (i32, i32) {
    %c0_i32 = arith.constant 0 : i32
    %c0_i32_0 = arith.constant 0 : i32
    %c0_i32_1 = arith.constant 0 : i32
    return %c0_i32, %c0_i32_0 : i32, i32
  }
  func.func @transform_3(%arg0: i32, %arg1: i32) -> (i32, i32) {
    %c0_i32 = arith.constant 0 : i32
    %c0_i32_0 = arith.constant 0 : i32
    return %arg0, %c0_i32 : i32, i32
  }
  func.func @transform_4(%arg0: i32, %arg1: i32) -> (i32, i32) {
    %c0_i32 = arith.constant 0 : i32
    %c0_i32_0 = arith.constant 0 : i32
    %c0_i32_1 = arith.constant 0 : i32
    return %c0_i32, %c0_i32_0 : i32, i32
  }
  func.func @transform_5(%arg0: i32, %arg1: i32) -> (i32, i32) {
    %c0_i32 = arith.constant 0 : i32
    return %arg0, %arg1 : i32, i32
  }
}

</mosaic_0001>

<bundles_post_ra>
// kernel: tpu_custom_call.1
= control target key start
LH: loop header
LB: loop body
LE: loop exit
PB: predicated region body
PF: predicated region fallthrough
CT: control target
= control target key end

     0   :  { %s902_s0 = inlined_call_operand.<no memory space> [shape: f32[1,1], index: 0, kind: input, shape index: {}]   ;;  %s903_s1 = inlined_call_operand.vmem [shape: f32[16,32], index: 1, kind: input, shape index: {}]   ;;  %s904_s2 = inlined_call_operand.hbm [shape: f32[32,128], index: 2, kind: input, shape index: {}]   ;;  %s905_s3 = inlined_call_operand.vmem [shape: f32[16,1], index: 3, kind: input, shape index: {}]   ;;  %s906_s4 = inlined_call_operand.vmem [shape: f32[1,128], index: 4, kind: input, shape index: {}]   ;;  %s907_s5 = inlined_call_operand.hbm [shape: f32[16,128], index: 5, kind: output, shape index: {}]  }
   0x1   :  { %10 = sst [smem:[#allocation2]] %s902_s0 }
   0x2   :  { %11 = vsyncpa [#allocation4], 0 }
   0x3   :  { %12 = vsyncpa [#allocation5], 0 }
   0x4   :  { %14 = vsyncpa [#allocation5 + $0x1], 0  ;;  %s746_s20 = smov 0   ;;  %s748_s21 = smov 0  }
   0x5   :  { %s750_s22 = smov 0   ;;  %s752_s23 = smov 0  }
   0x6   :  { %s754_s24 = smov 0   ;;  %s756_s25 = smov 0  }
   0x7 LB: > { %s480_s0 = sadd.s32 4294967295, %s703_s25   ;;  %s481_s26 = sadd.s32 4294967294, %s703_s25   ;;  %s703_s25 = sphi %s756_s25, %s20_s25   ;;  %s699_s24 = sphi %s754_s24, %s925_s24   ;;  %s695_s23 = sphi %s752_s23, %s924_s23   ;;  %s691_s22 = sphi %s750_s22, %s923_s22   ;;  %s687_s21 = sphi %s748_s21, %s922_s21   ;;  %s683_s20 = sphi %s746_s20, %s921_s20  }
   0x8   : > { %s32_s27 = sadd.s32 1, %s699_s24  ;;  %s156_s28 = sadd.s32 1, %s691_s22 }
   0x9   : > { %p34_p0 = scmp.ge.s32.totalorder %s32_s27, 2  ;;  %p166_p1 = scmp.ne.s32.totalorder %s691_s22, %s687_s21 }
   0xa   : > { %p167_p2 = scmp.eq.s32.totalorder %s480_s0, 1  ;;  %p172_p3 = scmp.ne.s32.totalorder %s687_s21, %s683_s20 }
   0xb   : > { %s927_s27 = smov (%p34_p0, %s32_s27), 0  ;;  %p173_p5 = scmp.eq.s32.totalorder %s481_s26, 1 }
   0xc   : > { %p786_p4 = por %p167_p2, %p166_p1  ;;  %s151_s30 = ssub.s32 %s699_s24, %s927_s27 }
   0xd   : > { %p482_p6 = scmp.ge.s32.totalorder %s703_s25, 1  ;;  %p154_p7 = scmp.eq.s32.totalorder %s151_s30, 0 }
   0xe   : > { %s912_s29 = scalar_select %p786_p4, 1, 0 }
   0xf   : > { %p793_p8 = por %p173_p5, %p172_p3  ;;  %p180_p9 = scmp.lt.s32.totalorder %s703_s25, 3 }
  0x10   : > { %s799_s7 = scalar_select %p154_p7, %s691_s22, %s156_s28  }
  0x11   : > { %s913_s6 = scalar_select %p793_p8, 1, 0 }
  0x12   : > { %p801_p10 = pnand %p482_p6, %p180_p9  ;;  %p805_p11 = scmp.eq.s32.totalorder %s480_s0, 0 }
  0x13   : > { %s705_s10 = smov [#allocation3]   ;;  %s593_s15 = scalar_lea.hbm %s904_s2, 512 }
  0x14   : > { %s914_s8 = scalar_select %p801_p10, 1, 0 }
  0x15   : > { %s915_s9 = scalar_select %p805_p11, 1, 0 }
  0x16   : > { %p524_p12 = pneg %p801_p10  ;;  %s195_s11 = sshll.u32 %s705_s10, 4  ;;  %s196_s11 = int_to_ptr.vmem [resolvable:$true] %s195_s11 }
  0x17   : > { %p594_p0 = scmp.ne.s32.totalorder %s904_s2, %s593_s15  ;;  %p600_p5 = scmp.lt.u32.totalorder %s593_s15, %s904_s2 }
  0x18   : > { %p813_p13 = pnand %p805_p11, %p524_p12 }
  0x1a   : > { %p595_p1 = pneg %p813_p13 }
  0x1c   : > { %p596_p2 = pnand %p595_p1, %p594_p0 }
  0x1e   : > { %p597_p3 = pneg %p596_p2 }
  0x20   : > { %p602_p6 = pnand %p600_p5, %p597_p3 }
  0x22   : > { %605 = shalt.err (!%p602_p6)
}
  0x23   : > { %s606_s0 = scalar_lea.vmem %s196_s11, 512  ;;  %p614_p8 = scmp.lt.s32.totalorder %s196_s11, %s196_s11 }
  0x24   : > { %p607_p7 = scmp.ne.s32.totalorder %s196_s11, %s606_s0  ;;  %p615_p4 = scmp.lt.s32.totalorder %s606_s0, %s606_s0 }
  0x26   : > { %p609_p9 = pnand %p607_p7, %p595_p1  ;;  %p616_p11 = por %p615_p4, %p614_p8 }
  0x28   : > { %p610_p12 = pneg %p609_p9 }
  0x2a   : > { %p617_p10 = pnand %p616_p11, %p610_p12 }
  0x2c   : > { %620 = shalt.err (!%p617_p10)
}
  0x2d   : > { %s706_s26 = smov 128   ;;  %s707_s28 = smov 8  }
  0x2e   : > { %527 = dma.hbm_to_vmem [thread:$0]  (!%p813_p13), %s904_s2, 512, %s196_s11, [#allocation4], %s706_s26, %s706_s26, %s707_s28  }
  0x2f   : > { %p917_p0 = scmp.ne.s32.totalorder %s914_s8, 0 }
  0x30   : > { %p918_p2 = scmp.ne.s32.totalorder (!%p917_p0), %s915_s9, 0 }
  0x31   : > { %228 = sbr.rel (%p917_p0) target bundleno = 313 (0x139), region = 40 }
  0x38   : > { %674 = dma.done.wait (%p918_p2), [#allocation4], 512  }
  0x39   : > { %676 = vsyncadd (%p918_p2), [#allocation4], 4294966784  ;;  %p259_p4 = scmp.lt.s32.totalorder %s695_s23, 1  ;;  %v708_v0 = vmov 0.0|0.0   ;;  %vm709_vm0 = vmmov 0   ;;  %v710_v1 = vmov 0.0  }
  0x3a   : > { %512 = vmatprep.subr.bf16.mxu0 %v708_v0  ;;  %509 = vmatprep.mubr.msk.f32.mxu0 %vm709_vm0, %v710_v1  ;;  %v711_v2 = vmov 0   ;;  %v271_v3 = vld [vmem:[#allocation3] sm:$0xff]  ;;  %v272_v4 = vld [vmem:[#allocation3 + $0x8] sm:$0xff]  ;;  %v273_v5 = vld [vmem:[#allocation3 + $0x10] sm:$0xff]  ;;  %vm285_vm1 = vcmask 261120   ;;  %s279_s17 = sld [smem:[#allocation2]] }
  0x3b   : > { %s260_s12 = scalar_select %p259_p4, %s695_s23, 1  ;;  %590 = vset.pattern.permute.xlu0 %v711_v2  ;;  %v513_v6 = vpack.c.bf16 %v272_v4, %v271_v3  ;;  %v274_v7 = vld [vmem:[#allocation3 + $0x18] sm:$0xff]  ;;  %v491_v12 = vld [vmem:[%s906_s4] ss:$0 sm:$0xff] }
  0x3c   : > { %v516_v9 = vpack.c.bf16 %v274_v7, %v273_v5  ;;  %s256_s0 = sand.u32 1, %s687_s21   ;;  %s493_s28 = sshll.u32 %s695_s23, 7 }
  0x3d   : > { %s488_s11 = sshll.u32 %s260_s12, 3  ;;  %514 = vmatpush3.bf16.msra.mxu0 %v513_v6  ;;  %s487_s26 = sshll.u32 %s256_s0, 3 }
  0x3e   : > { %s266_s14 = scalar_lea.vmem %s905_s3, %s488_s11  ;;  %515 = vmatprep.subr.bf16.mxu0 %v708_v0  ;;  %s262_s16 = scalar_lea.vmem %s903_s1, %s488_s11 }
  0x3f   : > { %v278_v8 = vld [vmem:[%s266_s14] sm:$0xff]  ;;  %s258_s30 = scalar_lea.vmem [#allocation6], %s487_s26  ;;  %s855_s8 = scalar_lea.hbm %s907_s5, %s493_s28 }
  0x40   : > { %282 = vperm.xlu0 %590, %v278_v8   ;;  %v277_v10 = vld [vmem:[%s262_s16] sm:$0xff]  ;;  %v366_v16 = vstv %s279_s17  ;;  %s386_s10 = sshll.u32 %s258_s30, 4  ;;  %s372_s13 = scalar_lea.sflag [#allocation5], %s256_s0  ;;  %s857_s10 = int_to_ptr.vmem [resolvable:$true] %s386_s10 }
  0x41   : > { %517 = vmatpush3.bf16.msra.mxu0 %v516_v9  ;;  %s621_s14 = scalar_lea.vmem %s857_s10, 128  ;;  %p919_p10 = scmp.ne.s32.totalorder %s912_s29, 0 }
  0x42   : > { %p622_p8 = scmp.ne.s32.totalorder %s857_s10, %s621_s14  ;;  %s712_s23 = smov [#allocation6]  }
  0x43   : > { %s625_s9 = sshll.u32 %s712_s23, 4  ;;  %s626_s9 = int_to_ptr.vmem [resolvable:$false] %s625_s9 }
  0x44   : > { %510 = vmatmul.mubr.msk.f32.vlgmr.msra.gmra.mrb[0].mxu0 %vm285_vm1, %v277_v10  ;;  %p623_p11 = pnand %p622_p8, %p919_p10  ;;  %s627_s15 = scalar_lea.vmem %s626_s9, 256 }
  0x45   : > { %p628_p1 = scmp.lt.s32.totalorder %s857_s10, %s626_s9  ;;  %p629_p3 = scmp.lt.s32.totalorder %s627_s15, %s621_s14 }
  0x46   : > { %p624_p13 = pneg %p623_p11 }
  0x47   : > { %p630_p5 = por %p629_p3, %p628_p1 }
  0x49   : > { %p631_p6 = pnand %p630_p5, %p624_p13 }
  0xbf   : > { %v283_v11 = vpop.permute.xlu0 %282 }
 0x117   : > { %v355_v13 = vpop.f32.mrb[0].mxu0 }
 0x118   : > { %v356_v14 = vadd.f32 %v355_v13, %v283_v11  ;;  %v511_v15 = vpop.f32.mrb[1].mxu0 }
 0x11a   : > { %v365_v17 = vadd.f32 %v491_v12, %v356_v14 }
 0x11c   : > { %v367_v18 = vmin.f32 %v365_v17, %v366_v16 }
 0x11e   : > { %v368_v19 = vmul.f32 1.442695, %v367_v18 }
 0x120   : > { %591 = vpow2.f32 %v368_v19 }
 0x12a   : > { %v592_v20 = vpop.eup %591 }
 0x12b   : > { %370 = vst [vmem:[%s258_s30] sm:$0xff] %v592_v20 }
 0x12c   : > { %634 = shalt.err (!%p631_p6)
}
 0x12d   : > { %s635_s16 = scalar_lea.hbm %s855_s8, 128  ;;  %s639_s19 = scalar_lea.hbm %s907_s5, 256 }
 0x12e   : > { %p636_p7 = scmp.ne.s32.totalorder %s855_s8, %s635_s16  ;;  %p640_p0 = scmp.lt.u32.totalorder %s855_s8, %s907_s5 }
 0x12f   : > { %p641_p2 = scmp.lt.u32.totalorder %s639_s19, %s635_s16  ;;  %p643_p8 = scmp.lt.u32.totalorder %s635_s16, %s855_s8 }
 0x130   : > { %p637_p9 = pnand %p636_p7, %p919_p10 }
 0x131   : > { %p642_p4 = por %p641_p2, %p640_p0 }
 0x132   : > { %p638_p12 = pneg %p637_p9 }
 0x133   : > { %p644_p11 = por %p643_p8, %p642_p4 }
 0x135   : > { %p645_p13 = pnand %p644_p11, %p638_p12 }
 0x137   : > { %648 = shalt.err (!%p645_p13)
}
 0x138   : > { %522 = dma.vmem_to_hbm [thread:$0]  (%p919_p10), %s857_s10, 128, %s855_s8, %s372_s13  }
 0x139 PF: > { %p534_p1 = scmp.ge.s32.totalorder %s703_s25, 2  ;;  %s398_s28 = sand.u32 1, %s683_s20  }
 0x13a   : > { %p920_p3 = scmp.ne.s32.totalorder %s913_s6, 0  ;;  %s399_s30 = scalar_lea.sflag [#allocation5], %s398_s28 }
 0x13c   : > { %p529_p5 = pnand %p534_p1, %p920_p3 }
 0x13e   : > { %678 = dma.done.wait (!%p529_p5), %s399_s30, 128  }
 0x13f   : > { %680 = vsyncadd (!%p529_p5), %s399_s30, 4294967168  ;;  %s20_s25 = sadd.s32 1, %s703_s25   ;;  %s921_s20 = smov %s687_s21 }
 0x140   : > { %p17_p6 = scmp.ge.s32.totalorder %s20_s25, 4   ;;  %s922_s21 = smov %s691_s22 }
 0x141   : > { %s923_s22 = smov %s799_s7  ;;  %s924_s23 = smov %s699_s24 }
 0x142   : > { %s925_s24 = smov %s927_s27  ;;  %19 = sbr.rel (!%p17_p6) target bundleno = 7 (0x7), region = 85 }
 0x149   :  { %404 = vsyncpa [#allocation4], 1 }
 0x14a   :  { %406 = vsyncpa [#allocation4 + $0x1], 1 }
 0x14b   :  { %407 = vsyncpa [#allocation5], 1 }
 0x14c   :  { %409 = vsyncpa [#allocation5 + $0x1], 1 }

</bundles_post_ra>
